<compile_context>
chip_gen: v5e
topology: v5e:2x2
jax: 0.10.0
libtpu: 0.0.40
codegen_flags: <defaults>
</compile_context>

<pallas_src>
import functools

import jax
import jax.numpy as jnp
from jax.experimental import pallas as pl
from jax.experimental.pallas import tpu as pltpu


def _logreg_kernel(x_ref, w_ref, b_ref, o_ref, *, compute_dtype):
    # x: (tb, D), w: (tn, D) in nn.Linear layout (contraction on D, so no
    # materialized transpose), bias: (1, tn) f32, out: (tb, tn) f32.
    x = x_ref[...].astype(compute_dtype)
    w = w_ref[...].astype(compute_dtype)
    logits = jax.lax.dot_general(
        x, w,
        dimension_numbers=(((1,), (1,)), ((), ())),
        preferred_element_type=jnp.float32,
    )
    logits = logits + b_ref[...]                       # (1, tn) broadcast
    o_ref[...] = jax.nn.sigmoid(logits).astype(o_ref.dtype)


def _vmem_capacity_bytes():
    try:
        cap = getattr(pltpu.get_tpu_info(), "vmem_capacity_bytes", None)
        if cap:
            return int(cap)
    except Exception:
        pass
    return 64 * 1024 * 1024            # conservative fallback (v7x per-TC size)


def text_logistic_regression(x, weight, bias, *, max_batch_tile=1024,
                             class_tile=256, compute_dtype=jnp.bfloat16):
    """x: [B, D]; weight: [C, D] (nn.Linear layout); bias: [C]. Returns [B, C] f32."""
    B, D = x.shape
    C = weight.shape[0]
    bias2d = bias.astype(jnp.float32).reshape(1, C)

    x_item = x.dtype.itemsize
    w_item = weight.dtype.itemsize

    # Class tile: full C when small (block dim == full array dim is always
    # legal -> no 128-padding, no post-slice, masked stores only at the true
    # edge); 256 when tiling large C (full MXU columns on v6e/v7x).
    tn = C if C <= class_tile else class_tile

    # Batch tile: sized from the full per-iteration VMEM footprint.
    cap = _vmem_capacity_bytes()
    budget = min(cap // 2, 64 * 1024 * 1024)          # headroom for compiler scratch
    w_bytes = 2 * tn * D * w_item                     # double-buffered W tile
    b_bytes = 2 * 8 * max(tn, 128) * 4                # bias tile (padded to 8x128)
    per_row = 2 * (D * x_item + tn * 4)               # x row + f32 out row, 2-buffered
    tb = max((budget - w_bytes - b_bytes) // max(per_row, 1), 8)
    tb = min(int(tb), max_batch_tile)
    tb = max(8, (tb // 8) * 8)                        # sublane-aligned
    if tb >= B:
        tb = B                                        # single full-dim batch block

    grid = (pl.cdiv(B, tb), pl.cdiv(C, tn))           # class axis innermost

    footprint = 2 * tb * D * x_item + w_bytes + b_bytes + 2 * tb * tn * 4
    vmem_limit = int(min(cap, max(footprint + (2 << 20), 16 * 1024 * 1024)))

    cost = pl.CostEstimate(
        flops=2 * B * D * C,
        transcendentals=B * C,
        bytes_accessed=B * D * x_item + C * D * w_item + C * 4 + B * C * 4,
    )

    kernel = functools.partial(_logreg_kernel, compute_dtype=compute_dtype)

    # NOTE: when C <= class_tile the W / bias block indices are constant, so
    # the pipeline fetches them once and keeps them resident; their second
    # buffer is accounted for in `footprint` rather than trimmed away.
    out = pl.pallas_call(
        kernel,
        out_shape=jax.ShapeDtypeStruct((B, C), jnp.float32),
        grid_spec=pltpu.PrefetchScalarGridSpec(
            num_scalar_prefetch=0,
            grid=grid,
            in_specs=[
                pl.BlockSpec((tb, D), lambda i, j: (i, 0)),   # x tiles stream
                pl.BlockSpec((tn, D), lambda i, j: (j, 0)),   # W (class-tiled)
                pl.BlockSpec((1, tn), lambda i, j: (0, j)),   # bias
            ],
            out_specs=pl.BlockSpec((tb, tn), lambda i, j: (i, j)),
        ),
        compiler_params=pltpu.CompilerParams(
            dimension_semantics=("parallel", "parallel"),
            vmem_limit_bytes=vmem_limit,
        ),
        cost_estimate=cost,
    )(x, weight, bias2d)

    return out


def _reference(x, weight, bias):
    return jax.nn.sigmoid(x @ weight.T + bias)


if __name__ == "__main__":
    key = jax.random.PRNGKey(0)
    batch, input_dim, num_classes = 8, 32, 8

    kx, kw, kb = jax.random.split(key, 3)
    x = jax.random.normal(kx, (batch, input_dim), dtype=jnp.float32)
    # Deterministic synthetic parameters (nn.Linear shapes: [C, D] weight, [C] bias).
    weight = jax.random.normal(kw, (num_classes, input_dim), dtype=jnp.float32) * 0.1
    bias = jax.random.normal(kb, (num_classes,), dtype=jnp.float32) * 0.1

    out = text_logistic_regression(x, weight, bias)
    jax.block_until_ready(out)
    ref = _reference(x, weight, bias)
    assert out.shape == (batch, num_classes)
    # bf16 MXU inputs with f32 accumulation vs pure-f32 reference.
    assert jnp.allclose(out, ref, atol=2e-2), float(jnp.max(jnp.abs(out - ref)))

    # Ragged batch with forced tiling: exercises the cdiv grid / masked
    # boundary-block path (B not a multiple of the batch tile).
    batch2 = 50
    x2 = jax.random.normal(kx, (batch2, input_dim), dtype=jnp.float32)
    out2 = text_logistic_regression(x2, weight, bias, max_batch_tile=16)
    jax.block_until_ready(out2)
    ref2 = _reference(x2, weight, bias)
    assert out2.shape == (batch2, num_classes)
    assert jnp.allclose(out2, ref2, atol=2e-2), float(jnp.max(jnp.abs(out2 - ref2)))

    print("KERNEL_OK")
</pallas_src>

<mosaic_0001>
module attributes {stable_mosaic.version = 11 : i64} {
  func.func @_logreg_kernel(%arg0: i32, %arg1: i32, %arg2: memref<8x32xf32, #tpu.memory_space<vmem>>, %arg3: memref<8x32xf32, #tpu.memory_space<vmem>>, %arg4: memref<1x8xf32, #tpu.memory_space<vmem>>, %arg5: memref<8x8xf32, #tpu.memory_space<vmem>>) attributes {dimension_semantics = [#tpu.dimension_semantics<parallel>, #tpu.dimension_semantics<parallel>], iteration_bounds = array<i64: 1, 1>, scalar_prefetch = 0 : i64, scratch_operands = 0 : i64, tpu.core_type = #tpu.core_type<tc>, window_params = [{transform_indices = @transform_0, window_bounds = array<i64: 8, 32>}, {transform_indices = @transform_1, window_bounds = array<i64: 8, 32>}, {transform_indices = @transform_2, window_bounds = array<i64: 1, 8>}, {transform_indices = @transform_3, window_bounds = array<i64: 8, 8>}]} {
    %c0 = arith.constant 0 : index
    %c0_0 = arith.constant 0 : index
    %0 = vector.load %arg2[%c0, %c0_0] : memref<8x32xf32, #tpu.memory_space<vmem>>, vector<8x32xf32>
    %1 = arith.truncf %0 : vector<8x32xf32> to vector<8x32xbf16>
    %c0_1 = arith.constant 0 : index
    %c0_2 = arith.constant 0 : index
    %2 = vector.load %arg3[%c0_1, %c0_2] : memref<8x32xf32, #tpu.memory_space<vmem>>, vector<8x32xf32>
    %3 = arith.truncf %2 : vector<8x32xf32> to vector<8x32xbf16>
    %cst = arith.constant dense<0.000000e+00> : vector<8x8xf32>
    %4 = tpu.matmul %1, %3, %cst {dimension_numbers = #tpu.dot_dimension_numbers<[1], [1], [0], [0], [0, 0, 1, 0], [], []>} : vector<8x32xbf16>, vector<8x32xbf16>, vector<8x8xf32> -> vector<8x8xf32>
    %c0_3 = arith.constant 0 : index
    %c0_4 = arith.constant 0 : index
    %5 = vector.load %arg4[%c0_3, %c0_4] : memref<1x8xf32, #tpu.memory_space<vmem>>, vector<1x8xf32>
    %6 = vector.broadcast %5 : vector<1x8xf32> to vector<8x8xf32>
    %7 = arith.addf %4, %6 : vector<8x8xf32>
    %8 = arith.negf %7 : vector<8x8xf32>
    %9 = math.exp %8 : vector<8x8xf32>
    %cst_5 = arith.constant 1.000000e+00 : f32
    %10 = vector.broadcast %cst_5 : f32 to vector<8x8xf32>
    %11 = arith.addf %10, %9 : vector<8x8xf32>
    %12 = arith.divf %10, %11 : vector<8x8xf32>
    %c0_6 = arith.constant 0 : index
    %c0_7 = arith.constant 0 : index
    %13 = vector.load %arg5[%c0_6, %c0_7] : memref<8x8xf32, #tpu.memory_space<vmem>>, vector<8x8xf32>
    tpu.vector_store %arg5[%c0_6, %c0_7], %12 {strides = array<i32>} : memref<8x8xf32, #tpu.memory_space<vmem>>, vector<8x8xf32>,
    return
  }
  func.func @transform_0(%arg0: i32, %arg1: i32) -> (i32, i32) {
    %c0_i32 = arith.constant 0 : i32
    %c0_i32_0 = arith.constant 0 : i32
    return %arg0, %c0_i32 : i32, i32
  }
  func.func @transform_1(%arg0: i32, %arg1: i32) -> (i32, i32) {
    %c0_i32 = arith.constant 0 : i32
    %c0_i32_0 = arith.constant 0 : i32
    return %arg1, %c0_i32 : i32, i32
  }
  func.func @transform_2(%arg0: i32, %arg1: i32) -> (i32, i32) {
    %c0_i32 = arith.constant 0 : i32
    %c0_i32_0 = arith.constant 0 : i32
    return %c0_i32, %arg1 : i32, i32
  }
  func.func @transform_3(%arg0: i32, %arg1: i32) -> (i32, i32) {
    %c0_i32 = arith.constant 0 : i32
    return %arg0, %arg1 : i32, i32
  }
}

</mosaic_0001>

<bundles_post_ra>
// kernel: tpu_custom_call.1
= control target key start
LH: loop header
LB: loop body
LE: loop exit
PB: predicated region body
PF: predicated region fallthrough
CT: control target
= control target key end

     0   :  { %8 = vsyncpa [#allocation3], 0  ;;  %s234_s0 = inlined_call_operand.hbm [shape: f32[8,32], index: 0, kind: input, shape index: {}]   ;;  %s235_s1 = inlined_call_operand.hbm [shape: f32[8,32], index: 1, kind: input, shape index: {}]   ;;  %s236_s2 = inlined_call_operand.vmem [shape: f32[1,8], index: 2, kind: input, shape index: {}]   ;;  %s237_s3 = inlined_call_operand.hbm [shape: f32[8,8], index: 3, kind: output, shape index: {}]  }
   0x1   :  { %9 = vsyncpa [#allocation6], 0 }
   0x2   :  { %10 = vsyncpa [#allocation4], 0  ;;  %s16_s14 = sshll.u32 %s234_s0, 4  ;;  %s199_s15 = smov [#allocation2]   ;;  %s17_s14 = int_to_ptr.hbm [resolvable:$true] %s16_s14 }
   0x3   :  { %s18_s16 = sshll.u32 %s199_s15, 4  ;;  %s27_s19 = sshll.u32 %s235_s1, 4  ;;  %s19_s16 = int_to_ptr.vmem [resolvable:$true] %s18_s16  ;;  %s28_s19 = int_to_ptr.hbm [resolvable:$true] %s27_s19 }
   0x4   :  { %21 = dma.hbm_to_vmem [thread:$0]  %s17_s14, 128, %s19_s16, [#allocation3]  }
   0x5   :  { %s200_s20 = smov [#allocation5]  }
   0x6   :  { %s29_s21 = sshll.u32 %s200_s20, 4  ;;  %s30_s21 = int_to_ptr.vmem [resolvable:$true] %s29_s21 }
   0x7   :  { %32 = dma.hbm_to_vmem [thread:$0]  %s28_s19, 128, %s30_s21, [#allocation6]  }
   0x8   :  { %193 = dma.done.wait [#allocation3], 128  }
   0x9   :  { %194 = vsyncadd [#allocation3], 4294967168 }
   0xa   :  { %195 = dma.done.wait [#allocation6], 128  }
   0xb   :  { %196 = vsyncadd [#allocation6], 4294967168  ;;  %v46_v0 = vld [vmem:[#allocation5] sm:$0xff]  ;;  %vm52_vm0 = vcmask 261120   ;;  %v44_v3 = vld [vmem:[#allocation2] sm:$0xff]  ;;  %s201_s22 = smov [#allocation7]  }
   0xc   :  { %v47_v1 = vpack.c.bf16 %v46_v0, %v46_v0  ;;  %v45_v4 = vpack.c.bf16 %v44_v3, %v44_v3  ;;  %v116_v5 = vld [vmem:[%s236_s2] ss:$0 sm:$0xff]  ;;  %s98_s23 = sshll.u32 %s201_s22, 4  ;;  %s100_s2 = sshll.u32 %s237_s3, 4  ;;  %vm91_vm4 = vcmask 64512   ;;  %s99_s23 = int_to_ptr.vmem [resolvable:$true] %s98_s23  ;;  %s101_s2 = int_to_ptr.hbm [resolvable:$true] %s100_s2 }
   0xe   :  { %v57_v2 = vsel %vm52_vm0, %v47_v1, 0 }
   0xf   :  { %66 = vmatpush.bf16.xpose.msra.mxu0 %v57_v2 }
  0x16   :  { %111 = vmatmul.msk.bf16.vlgmr.msra.gmra.mxu0 %vm52_vm0, %v45_v4 }
  0x93   :  { %v68_v6 = vpop.f32.mrf.mxu0 }
  0x94   :  { %v69_v7 = vadd.f32 %v116_v5, %v68_v6 }
  0x96   :  { %v112_v8 = vmul.f32 -1.442695, %v69_v7 }
  0x98   :  { %117 = vpow2.f32 %v112_v8 }
  0x9b   :  { %v70_v9 = vpop.f32.mrf.mxu0 }
  0x9e   :  { %v118_v10 = vpop.eup %117 }
  0x9f   :  { %v75_v11 = vadd.f32 1.0, %v118_v10 }
  0xa1   :  { %119 = vrcp.f32 %v75_v11  ;;  %v87_v15 = vand.u32 2147483648, %v75_v11  ;;  %v85_v17 = vand.u32 2147483647, %v75_v11  ;;  %vm81_vm2 = vweird.f32 %v75_v11 }
  0xa3   :  { %v88_v19 = vor.u32 1.1754944e-38, %v87_v15  ;;  %vm86_vm5 = vcmp.eq.f32.partialorder %v85_v17, 8.507059e+37 }
  0xa7   :  { %v120_v12 = vpop.eup %119 }
  0xa8   :  { %v77_v13 = vmul.f32 %v120_v12, %v75_v11  ;;  %vm82_vm1 = vweird.f32 %v120_v12 }
  0xa9   :  { %vm83_vm3 = vmor %vm81_vm2, %vm82_vm1 }
  0xaa   :  { %v78_v14 = vsub.f32 1.0, %v77_v13 }
  0xac   :  { %v79_v16 = vmul.f32 %v120_v12, %v78_v14 }
  0xae   :  { %v80_v18 = vadd.f32 %v120_v12, %v79_v16 }
  0xb0   :  { %v84_v20 = vsel %vm83_vm3, %v120_v12, %v80_v18 }
  0xb1   :  { %v89_v21 = vsel %vm86_vm5, %v88_v19, %v84_v20 }
  0xb2   :  { %92 = vst.msk [vmem:[#allocation7] sm:$0xff] %vm91_vm4, %v89_v21 }
  0xb3   :  { %103 = dma.vmem_to_hbm [thread:$0]  %s99_s23, 128, %s101_s2, [#allocation4]  }
  0xb4   :  { %197 = dma.done.wait [#allocation4], 128  }
  0xb5   :  { %198 = vsyncadd [#allocation4], 4294967168 }
  0xb6   :  { %108 = vsyncpa [#allocation3], 1 }
  0xb7   :  { %109 = vsyncpa [#allocation6], 1 }
  0xb8   :  { %110 = vsyncpa [#allocation4], 1 }

</bundles_post_ra>
